<compile_context>
chip_gen: v7x
topology: tpu7x:2x2x1
jax: 0.10.0
libtpu: 0.0.40
codegen_flags: <defaults>
</compile_context>

<pallas_src>
import functools

import jax
import jax.numpy as jnp
from jax.experimental import pallas as pl
from jax.experimental.pallas import tpu as pltpu

_EPS = 1e-8
_LANE = 128
_CHUNK_ROWS = 256                       # in-kernel accumulation chunk (mult. of 32)
_TARGET_BLOCK_BYTES = 4 * 1024 * 1024   # ~4 MiB per input block (8 MiB dbl-buffered)
_VMEM_LIMIT_BYTES = 32 * 1024 * 1024    # safe on v5e/v6e (128 MiB) and v7x (64 MiB/TC)


def _num_tensorcores():
    """Best-effort TensorCores-per-device (2 on v7x / megacore parts, else 1)."""
    try:
        dev = jax.devices()[0]
        kind = str(getattr(dev, "device_kind", "")).lower()
        if any(tag in kind for tag in ("v7", "7x", "v4", "v5p")):
            return 2
    except Exception:
        pass
    return 1


def _entropy_kernel(x_ref, o_ref, acc_ref, *, scale, rows, tm, chunk, steps, masked):
    p = pl.program_id(0)    # partial / core index   ("parallel")
    i = pl.program_id(1)    # reduction step         ("arbitrary")

    @pl.when(i == 0)
    def _():
        acc_ref[...] = jnp.zeros_like(acc_ref)

    row0 = (p * steps + i) * tm          # nominal (unclamped) first row of this tile
    n_chunks = tm // chunk

    def chunk_body(c, do_mask):
        off = c * chunk
        if not isinstance(off, int):
            off = pl.multiple_of(off, chunk)
        x = x_ref[pl.ds(off, chunk), :].astype(jnp.float32)   # cast in-register
        v = x * jnp.log2(x + _EPS)                            # EUP log + VPU mul
        if do_mask:
            # Rows at/above `rows` are partial-block garbage or duplicated reads
            # from a clamped overflow tile -> zero their contribution.
            ridx = (row0 + off) + jax.lax.broadcasted_iota(
                jnp.int32, (chunk, _LANE), 0)
            v = jnp.where(ridx < rows, v, 0.0)
        # (8,128) vector accumulator: pure VPU adds, no per-step XLU reduce.
        acc_ref[...] += v.reshape(chunk // 8, 8, _LANE).sum(axis=0)

    def accumulate(do_mask):
        if n_chunks == 1:
            chunk_body(0, do_mask)
        else:
            def body(c, carry):
                chunk_body(c, do_mask)
                return carry
            jax.lax.fori_loop(0, n_chunks, body, 0)

    if masked:
        # Gate the mask to boundary/overflow tiles only: interior tiles take the
        # mask-free fast path.
        @pl.when(row0 + tm <= rows)
        def _():
            accumulate(False)

        @pl.when(row0 + tm > rows)
        def _():
            accumulate(True)
    else:
        accumulate(False)

    @pl.when(i == pl.num_programs(1) - 1)
    def _():
        # lane-dense (1,8,128) partial, already negated & scaled
        o_ref[...] = (-acc_ref[...] * scale).reshape(1, 8, _LANE)


def entropy(x, method="mean"):
    """Pallas TPU implementation of Entropy.forward. Returns a scalar f32."""
    assert method in ("mean", "sum"), "method must be `mean` or `sum`"
    n = x.size
    if n == 0:
        # match torch: mean of empty -> nan, sum of empty -> 0 (negated)
        return jnp.float32(jnp.nan) if method == "mean" else jnp.float32(0.0)

    scale = (1.0 / n) if method == "mean" else 1.0

    flat = x.reshape(-1)                 # free (bitcast) for contiguous arrays
    rows = n // _LANE
    rem = n % _LANE

    # --- ragged tail (<128 elems): fold in on the wrapper side (tiny) ---------
    tail_term = None
    if rem:
        tail = flat[rows * _LANE:].astype(jnp.float32)
        tail_term = jnp.sum(tail * jnp.log2(tail + _EPS))

    if rows == 0:                        # everything fit in the tail
        return (-tail_term * scale).astype(jnp.float32)

    if rem:
        # Lane-aligned prefix for the kernel.  (For ragged inputs XLA
        # materialises this slice once; lane-aligned inputs - the common case -
        # reshape with zero copies and no extra HBM pass.)
        prefix = flat[: rows * _LANE]
    else:
        prefix = flat
    slab = prefix.reshape(rows, _LANE)

    # --- tiling ----------------------------------------------------------------
    itemsize = jnp.dtype(x.dtype).itemsize
    sub = {4: 8, 2: 16, 1: 32}.get(itemsize, 8)   # min sublane multiple per dtype

    chunk = _CHUNK_ROWS
    if rows <= chunk:
        tm = pl.cdiv(rows, sub) * sub             # single small block
        chunk = tm
    else:
        max_rows = _TARGET_BLOCK_BYTES // (_LANE * itemsize)
        max_rows = max(chunk, (max_rows // chunk) * chunk)
        tm = min(max_rows, pl.cdiv(rows, chunk) * chunk)

    blocks = pl.cdiv(rows, tm)
    num_parts = 2 if (_num_tensorcores() >= 2 and blocks >= 2) else 1
    steps = pl.cdiv(blocks, num_parts)
    masked = (num_parts * steps * tm) != rows     # any partial/overflow tile?
    overflow = num_parts * steps > blocks         # any fully out-of-range tile?

    def x_index_map(pi, si):
        bi = pi * steps + si
        if overflow:
            # clamp so overflow tiles (fully masked anyway) never read OOB
            bi = jnp.minimum(bi, blocks - 1)
        return (bi, 0)

    cost = pl.CostEstimate(
        flops=3 * rows * _LANE,
        transcendentals=rows * _LANE,
        bytes_accessed=rows * _LANE * itemsize + num_parts * 8 * _LANE * 4,
    )

    partials = pl.pallas_call(
        functools.partial(
            _entropy_kernel,
            scale=scale, rows=rows, tm=tm, chunk=chunk, steps=steps, masked=masked),
        out_shape=jax.ShapeDtypeStruct((num_parts, 8, _LANE), jnp.float32),
        grid_spec=pltpu.PrefetchScalarGridSpec(
            num_scalar_prefetch=0,
            grid=(num_parts, steps),
            in_specs=[pl.BlockSpec((tm, _LANE), x_index_map)],
            out_specs=pl.BlockSpec((1, 8, _LANE), lambda pi, si: (pi, 0, 0)),
            scratch_shapes=[pltpu.VMEM((8, _LANE), jnp.float32)],
        ),
        compiler_params=pltpu.CompilerParams(
            # parallel axis -> both TensorCores on 2-TC parts; the reduction
            # axis carries the accumulator so it must stay "arbitrary".
            dimension_semantics=("parallel", "arbitrary"),
            vmem_limit_bytes=_VMEM_LIMIT_BYTES,
        ),
        cost_estimate=cost,
    )(slab)

    # tiny final reduce over num_parts*1024 lane-partials (negligible XLA op)
    result = jnp.sum(partials)
    if tail_term is not None:
        result = result - tail_term * scale
    return result


def _entropy_ref(x, method="mean"):
    xf = x.astype(jnp.float32)
    v = xf * jnp.log2(xf + _EPS)
    return -jnp.mean(v) if method == "mean" else -jnp.sum(v)


if __name__ == "__main__":
    key = jax.random.PRNGKey(0)
    k0, k1, k2, k3 = jax.random.split(key, 4)

    # Canonical probability-like NCHW input, as Entropy typically consumes.
    logits = jax.random.normal(k0, (2, 4, 16, 16), dtype=jnp.float32)
    x = jax.nn.softmax(logits.reshape(2, -1), axis=-1).reshape(2, 4, 16, 16)

    out_mean = jax.block_until_ready(entropy(x, method="mean"))
    out_sum = jax.block_until_ready(entropy(x, method="sum"))
    ref_mean = _entropy_ref(x, "mean")
    ref_sum = _entropy_ref(x, "sum")
    assert jnp.allclose(out_mean, ref_mean, rtol=1e-5, atol=1e-5), (out_mean, ref_mean)
    assert jnp.allclose(out_sum, ref_sum, rtol=1e-5, atol=1e-4), (out_sum, ref_sum)

    # Ragged shape: exercises the wrapper-side tail + in-kernel boundary mask.
    y = jax.nn.sigmoid(jax.random.normal(k1, (3, 5, 37, 29), dtype=jnp.float32))
    out_r = jax.block_until_ready(entropy(y, method="mean"))
    ref_r = _entropy_ref(y, "mean")
    assert jnp.allclose(out_r, ref_r, rtol=1e-5, atol=1e-5), (out_r, ref_r)

    # Multi-chunk block: exercises the in-kernel fori_loop accumulation path.
    z = jax.nn.sigmoid(jax.random.normal(k2, (4, 8, 64, 64), dtype=jnp.float32))
    out_z = jax.block_until_ready(entropy(z, method="mean"))
    ref_z = _entropy_ref(z, "mean")
    assert jnp.allclose(out_z, ref_z, rtol=1e-5, atol=1e-5), (out_z, ref_z)

    # Ragged + multi-chunk: boundary-tile masked path inside the chunk loop.
    w = jax.nn.sigmoid(jax.random.normal(k3, (3, 7, 61, 50), dtype=jnp.float32))
    out_w = jax.block_until_ready(entropy(w, method="sum"))
    ref_w = _entropy_ref(w, "sum")
    assert jnp.allclose(out_w, ref_w, rtol=1e-4, atol=1e-3), (out_w, ref_w)

    print("KERNEL_OK")
</pallas_src>

<mosaic_0001>
module attributes {stable_mosaic.version = 11 : i64} {
  func.func @_entropy_kernel(%arg0: i32, %arg1: i32, %arg2: memref<16x128xf32, #tpu.memory_space<vmem>>, %arg3: memref<1x8x128xf32, #tpu.memory_space<vmem>>, %arg4: memref<8x128xf32, #tpu.memory_space<vmem>>) attributes {dimension_semantics = [#tpu.dimension_semantics<parallel>, #tpu.dimension_semantics<arbitrary>], iteration_bounds = array<i64: 1, 1>, scalar_prefetch = 0 : i64, scratch_operands = 1 : i64, tpu.core_type = #tpu.core_type<tc>, window_params = [{transform_indices = @transform_0, window_bounds = array<i64: 16, 128>}, {transform_indices = @transform_1, window_bounds = array<i64: 1, 8, 128>}]} {
    %c0_i32 = arith.constant 0 : i32
    %0 = arith.cmpi eq, %arg1, %c0_i32 : i32
    %1 = arith.extui %0 : i1 to i32
    %c0_i32_0 = arith.constant 0 : i32
    %2 = arith.cmpi ne, %1, %c0_i32_0 : i32
    scf.if %2 {
      %cst_10 = arith.constant 0.000000e+00 : f32
      %19 = vector.broadcast %cst_10 : f32 to vector<8x128xf32>
      %c0_11 = arith.constant 0 : index
      %c0_12 = arith.constant 0 : index
      %20 = vector.load %arg4[%c0_11, %c0_12] : memref<8x128xf32, #tpu.memory_space<vmem>>, vector<8x128xf32>
      tpu.vector_store %arg4[%c0_11, %c0_12], %19 {strides = array<i32>} : memref<8x128xf32, #tpu.memory_space<vmem>>, vector<8x128xf32>,
    } else {
    }
    %c0 = arith.constant 0 : index
    %c0_1 = arith.constant 0 : index
    %3 = vector.load %arg2[%c0, %c0_1] : memref<16x128xf32, #tpu.memory_space<vmem>>, vector<16x128xf32>
    %cst = arith.constant 9.99999993E-9 : f32
    %4 = vector.broadcast %cst : f32 to vector<16x128xf32>
    %5 = arith.addf %3, %4 : vector<16x128xf32>
    %6 = math.log %5 : vector<16x128xf32>
    %cst_2 = arith.constant 2.000000e+00 : f32
    %7 = math.log %cst_2 : f32
    %8 = vector.broadcast %7 : f32 to vector<16x128xf32>
    %9 = arith.divf %6, %8 : vector<16x128xf32>
    %10 = arith.mulf %3, %9 : vector<16x128xf32>
    %c0_3 = arith.constant 0 : index
    %c0_4 = arith.constant 0 : index
    %11 = vector.load %arg4[%c0_3, %c0_4] : memref<8x128xf32, #tpu.memory_space<vmem>>, vector<8x128xf32>
    %12 = vector.shape_cast %10 : vector<16x128xf32> to vector<2x8x128xf32>
    %cst_5 = arith.constant dense<0.000000e+00> : vector<8x128xf32>
    %13 = vector.multi_reduction <add>, %12, %cst_5 [0] : vector<2x8x128xf32> to vector<8x128xf32>
    %14 = arith.addf %11, %13 : vector<8x128xf32>
    %c0_6 = arith.constant 0 : index
    %c0_7 = arith.constant 0 : index
    %15 = vector.load %arg4[%c0_6, %c0_7] : memref<8x128xf32, #tpu.memory_space<vmem>>, vector<8x128xf32>
    tpu.vector_store %arg4[%c0_6, %c0_7], %14 {strides = array<i32>} : memref<8x128xf32, #tpu.memory_space<vmem>>, vector<8x128xf32>,
    %c0_i32_8 = arith.constant 0 : i32
    %16 = arith.cmpi eq, %arg1, %c0_i32_8 : i32
    %17 = arith.extui %16 : i1 to i32
    %c0_i32_9 = arith.constant 0 : i32
    %18 = arith.cmpi ne, %17, %c0_i32_9 : i32
    scf.if %18 {
      %c0_10 = arith.constant 0 : index
      %c0_11 = arith.constant 0 : index
      %19 = vector.load %arg4[%c0_10, %c0_11] : memref<8x128xf32, #tpu.memory_space<vmem>>, vector<8x128xf32>
      %cst_12 = arith.constant 0.000000e+00 : f32
      %20 = vector.broadcast %cst_12 : f32 to vector<8x128xf32>
      %21 = arith.subf %20, %19 : vector<8x128xf32>
      %cst_13 = arith.constant 4.8828125E-4 : f32
      %22 = vector.broadcast %cst_13 : f32 to vector<8x128xf32>
      %23 = arith.mulf %21, %22 : vector<8x128xf32>
      %24 = vector.shape_cast %23 : vector<8x128xf32> to vector<1x8x128xf32>
      %c0_14 = arith.constant 0 : index
      %c0_15 = arith.constant 0 : index
      %c0_16 = arith.constant 0 : index
      %25 = vector.load %arg3[%c0_14, %c0_15, %c0_16] : memref<1x8x128xf32, #tpu.memory_space<vmem>>, vector<1x8x128xf32>
      tpu.vector_store %arg3[%c0_14, %c0_15, %c0_16], %24 {strides = array<i32>} : memref<1x8x128xf32, #tpu.memory_space<vmem>>, vector<1x8x128xf32>,
    } else {
    }
    return
  }
  func.func @transform_0(%arg0: i32, %arg1: i32) -> (i32, i32) {
    %c1_i32 = arith.constant 1 : i32
    %0 = arith.muli %arg0, %c1_i32 : i32
    %1 = arith.addi %0, %arg1 : i32
    %c0_i32 = arith.constant 0 : i32
    %c0_i32_0 = arith.constant 0 : i32
    return %1, %c0_i32 : i32, i32
  }
  func.func @transform_1(%arg0: i32, %arg1: i32) -> (i32, i32, i32) {
    %c0_i32 = arith.constant 0 : i32
    %c0_i32_0 = arith.constant 0 : i32
    %c0_i32_1 = arith.constant 0 : i32
    return %arg0, %c0_i32, %c0_i32_0 : i32, i32, i32
  }
}

</mosaic_0001>

<bundles_post_ra>
// kernel: tpu_custom_call.1
= control target key start
LH: loop header
LB: loop body
LE: loop exit
PB: predicated region body
PF: predicated region fallthrough
CT: control target
= control target key end

     0   :  { %6 = vsyncpa [#allocation4], 0  ;;  %s167_s0 = inlined_call_operand.hbm [shape: f32[16,128], index: 0, kind: input, shape index: {}]   ;;  %s168_s1 = inlined_call_operand.hbm [shape: f32[1,8,128], index: 1, kind: output, shape index: {}]  }
   0x1   :  { %7 = vsyncpa [#allocation5], 0  ;;  %s129_s6 = smov [#allocation3]   ;;  %s81_s10 = scalar_lea.hbm %s167_s0, 256 }
   0x2   :  { %s17_s7 = sshll.u32 %s129_s6, 4  ;;  %p82_p0 = scmp.ne.s32.totalorder %s167_s0, %s81_s10  ;;  %s18_s7 = int_to_ptr.vmem [resolvable:$true] %s17_s7 }
   0x3   :  { %p85_p1 = scmp.lt.u32.totalorder %s81_s10, %s167_s0 }
   0x5   :  { %p87_p2 = pnand %p85_p1, %p82_p0 }
   0x7   :  { %90 = shalt.err (!%p87_p2)
}
   0x8   :  { %s91_s15 = scalar_lea.vmem %s18_s7, 256  ;;  %p96_p4 = scmp.lt.s32.totalorder %s18_s7, %s18_s7 }
   0x9   :  { %p92_p3 = scmp.ne.s32.totalorder %s18_s7, %s91_s15  ;;  %p97_p5 = scmp.lt.s32.totalorder %s91_s15, %s91_s15 }
   0xb   :  { %p98_p6 = por %p97_p5, %p96_p4 }
   0xd   :  { %p99_p7 = pnand %p98_p6, %p92_p3 }
   0xf   :  { %102 = shalt.err (!%p99_p7)
}
  0x10   :  { %s130_s16 = smov 128   ;;  %s131_s17 = smov 8  }
  0x11   :  { %23 = dma.hbm_to_vmem [thread:$0]  %s167_s0, 256, %s18_s7, [#allocation4], %s130_s16, %s130_s16, %s131_s17  }
  0x12   :  { %125 = dma.done.wait [#allocation4], 256  }
  0x13   :  { %126 = vsyncadd [#allocation4], 4294967040  ;;  %v34_v0 = vld [vmem:[#allocation3] sm:$0xff]  ;;  %v35_v1 = vld [vmem:[#allocation3 + $0x8] sm:$0xff]  ;;  %s132_s20 = smov [#allocation6]  }
  0x14   :  { %v36_v2 = vadd.f32 1e-08, %v34_v0  ;;  %v37_v3 = vadd.f32 1e-08, %v35_v1  ;;  %s64_s21 = sshll.u32 %s132_s20, 4  ;;  %s65_s21 = int_to_ptr.vmem [resolvable:$true] %s64_s21 }
  0x15   :  { %s103_s0 = scalar_lea.vmem %s65_s21, 128  ;;  %p108_p9 = scmp.lt.s32.totalorder %s65_s21, %s65_s21 }
  0x16   :  { %77 = vlog2.f32 %v36_v2  ;;  %p104_p8 = scmp.ne.s32.totalorder %s65_s21, %s103_s0  ;;  %p109_p10 = scmp.lt.s32.totalorder %s103_s0, %s103_s0 }
  0x17   :  { %79 = vlog2.f32 %v37_v3 }
  0x18   :  { %p110_p11 = por %p109_p10, %p108_p9 }
  0x1a   :  { %p111_p12 = pnand %p110_p11, %p104_p8 }
  0x20   :  { %v78_v4 = vpop.eup %77 }
  0x21   :  { %v80_v5 = vpop.eup %79  ;;  %v39_v6 = vmul.f32 0.6931472, %v78_v4 }
  0x22   :  { %v41_v7 = vmul.f32 0.6931472, %v80_v5 }
  0x23   :  { %v43_v8 = vmul.f32 1.442695, %v39_v6 }
  0x24   :  { %v44_v9 = vmul.f32 1.442695, %v41_v7 }
  0x25   :  { %v45_v10 = vmul.f32 %v43_v8, %v34_v0 }
  0x26   :  { %v46_v11 = vmul.f32 %v44_v9, %v35_v1 }
  0x28   :  { %v48_v12 = vadd.f32 %v46_v11, %v45_v10 }
  0x2a   :  { %v55_v13 = vsub.f32 0.0, %v48_v12 }
  0x2c   :  { %v56_v14 = vmul.f32 0.00048828125, %v55_v13 }
  0x2e   :  { %57 = vst [vmem:[#allocation6] sm:$0xff] %v56_v14 }
  0x2f   :  { %114 = shalt.err (!%p111_p12)
}
  0x30   :  { %s115_s24 = scalar_lea.hbm %s168_s1, 128 }
  0x31   :  { %p116_p13 = scmp.ne.s32.totalorder %s168_s1, %s115_s24  ;;  %p119_p0 = scmp.lt.u32.totalorder %s115_s24, %s168_s1 }
  0x33   :  { %p121_p1 = pnand %p119_p0, %p116_p13 }
  0x35   :  { %124 = shalt.err (!%p121_p1)
}
  0x36   :  { %67 = dma.vmem_to_hbm [thread:$0]  %s65_s21, 128, %s168_s1, [#allocation5]  }
  0x37   :  { %127 = dma.done.wait [#allocation5], 128  }
  0x38   :  { %128 = vsyncadd [#allocation5], 4294967168 }
  0x39   :  { %71 = vsyncpa [#allocation4], 1 }
  0x3a   :  { %72 = vsyncpa [#allocation5], 1 }

</bundles_post_ra>
